<compile_context>
chip_gen: v7x
topology: tpu7x:2x2x1
jax: 0.10.0
libtpu: 0.0.40
codegen_flags: <defaults>
</compile_context>

<pallas_src>
import jax
import jax.numpy as jnp
from jax.experimental import pallas as pl
from jax.experimental.pallas import tpu as pltpu


def kan_kernel(c_ref, nia_ref, wsum_ref, x_ref, b_ref, o_ref):
    # c_ref:    (K,)    SMEM   RBF centers
    # nia_ref:  (K,)    SMEM   -1 / (2 * widths^2)
    # wsum_ref: (K,)    SMEM   weights.sum(axis=0)
    # x_ref:    (TB, C) VMEM   lane-packed input tile (original dtype)
    # b_ref:    (1, C)  VMEM   lane-packed bias row (f32)
    # o_ref:    (TB, C) VMEM   output tile (original dtype)
    K = c_ref.shape[0]
    x = x_ref[...].astype(jnp.float32)                        # (TB, C) f32
    # Hoisted (once per tile) sublane-broadcast of the bias row.
    acc = jnp.broadcast_to(b_ref[...], x.shape).astype(jnp.float32)
    for k in range(K):                                        # static unroll, K is tiny
        d = x - c_ref[k]                                      # scalar splat from SMEM
        acc = acc + wsum_ref[k] * jnp.exp((d * d) * nia_ref[k])
    o_ref[...] = acc.astype(o_ref.dtype)


def kan_layer(x, weights, bias, centers, widths, *, tb=512):
    """Pallas implementation of KANLayer.forward.

    x:       (..., D) float, D must equal output_dim (same constraint the
             PyTorch bias broadcast imposes).
    weights: (O, K), bias: (O,), centers: (K,), widths: (K,)
    """
    orig_shape = x.shape
    orig_dtype = x.dtype
    D = orig_shape[-1]
    O, K = weights.shape
    assert D == O, "last dim of x must equal output_dim (PyTorch bias broadcast)"

    f32 = jnp.float32
    x2 = x.reshape(-1, D)
    B = x2.shape[0]

    # Fold the weights: summing over output_dim turns (O, K) into a K-vector.
    w_sum = jnp.sum(weights.astype(f32), axis=0)                    # (K,)
    neg_inv2w2 = -1.0 / (2.0 * widths.astype(f32) ** 2)             # (K,)
    c = centers.astype(f32)                                         # (K,)

    # Lane-dense packing: put g batch rows side by side so the last dim is 128
    # (the RBF + weighted sum is elementwise in (b, d); only the bias varies
    # along the packed lane axis, so it is tiled g times).
    g = 128 // D if (D < 128 and 128 % D == 0) else 1
    C = g * D
    b_row = jnp.tile(bias.astype(f32), g).reshape(1, C)             # (1, C)

    rows = pl.cdiv(B, g)
    tb = max(8, min(tb, ((rows + 7) // 8) * 8))
    tb -= tb % 8                                 # sublane tile multiple of 8
    rows_pad = pl.cdiv(rows, tb) * tb
    b_pad = rows_pad * g

    if b_pad != B:
        x2 = jnp.pad(x2, ((0, b_pad - B), (0, 0)))
    x_packed = x2.reshape(rows_pad, C)

    out = pl.pallas_call(
        kan_kernel,
        out_shape=jax.ShapeDtypeStruct((rows_pad, C), orig_dtype),
        grid=(rows_pad // tb,),
        in_specs=[
            pl.BlockSpec(memory_space=pltpu.MemorySpace.SMEM),      # centers
            pl.BlockSpec(memory_space=pltpu.MemorySpace.SMEM),      # -1/(2w^2)
            pl.BlockSpec(memory_space=pltpu.MemorySpace.SMEM),      # weights.sum(0)
            pl.BlockSpec((tb, C), lambda i: (i, 0)),                # x tile
            pl.BlockSpec((1, C), lambda i: (0, 0)),                 # bias row
        ],
        out_specs=pl.BlockSpec((tb, C), lambda i: (i, 0)),
        compiler_params=pltpu.CompilerParams(
            dimension_semantics=("parallel",)),
    )(c, neg_inv2w2, w_sum, x_packed, b_row)

    out = out.reshape(b_pad, D)[:B]
    return out.reshape(orig_shape)


def kan_layer_ref(x, weights, bias, centers, widths):
    """Pure-JAX reference mirroring the PyTorch code line-by-line."""
    kernels = jnp.exp(-(x[..., None] - centers) ** 2 / (2.0 * widths ** 2))
    activation = jnp.sum(jnp.matmul(kernels, weights.T), axis=-1) + bias
    return activation


if __name__ == "__main__":
    # Module config: input_dim == output_dim (required by the PyTorch bias
    # broadcast), small num_kernels.
    input_dim = 32
    output_dim = 32
    num_kernels = 8
    batch = 16

    key = jax.random.PRNGKey(0)
    kx, kw, kb = jax.random.split(key, 3)

    weights = jax.random.normal(kw, (output_dim, num_kernels), dtype=jnp.float32)
    bias = 0.1 * jax.random.normal(kb, (output_dim,), dtype=jnp.float32)
    centers = jnp.linspace(-1.0, 1.0, num_kernels, dtype=jnp.float32)
    widths = jnp.ones((num_kernels,), dtype=jnp.float32) * 0.1

    x = jax.random.normal(kx, (batch, input_dim), dtype=jnp.float32)

    out = jax.block_until_ready(kan_layer(x, weights, bias, centers, widths))

    ref = kan_layer_ref(x, weights, bias, centers, widths)
    assert out.shape == ref.shape == (batch, input_dim)
    err = float(jnp.max(jnp.abs(out - ref)))
    assert jnp.allclose(out, ref, atol=1e-4, rtol=1e-4), err

    print("KERNEL_OK")
</pallas_src>

<mosaic_0001>
module attributes {stable_mosaic.version = 11 : i64} {
  func.func @kan_kernel(%arg0: i32, %arg1: memref<8xf32, #tpu.memory_space<smem>>, %arg2: memref<8xf32, #tpu.memory_space<smem>>, %arg3: memref<8xf32, #tpu.memory_space<smem>>, %arg4: memref<8x128xf32, #tpu.memory_space<vmem>>, %arg5: memref<1x128xf32, #tpu.memory_space<vmem>>, %arg6: memref<8x128xf32, #tpu.memory_space<vmem>>) attributes {dimension_semantics = [#tpu.dimension_semantics<parallel>], iteration_bounds = array<i64: 1>, scalar_prefetch = 0 : i64, scratch_operands = 0 : i64, tpu.core_type = #tpu.core_type<tc>, window_params = [{transform_indices = @transform_0, window_bounds = array<i64: 8>}, {transform_indices = @transform_1, window_bounds = array<i64: 8>}, {transform_indices = @transform_2, window_bounds = array<i64: 8>}, {transform_indices = @transform_3, window_bounds = array<i64: 8, 128>}, {pipeline_mode = #tpu.pipeline_mode<synchronous>, transform_indices = @transform_4, window_bounds = array<i64: 1, 128>}, {transform_indices = @transform_5, window_bounds = array<i64: 8, 128>}]} {
    %c0 = arith.constant 0 : index
    %c0_0 = arith.constant 0 : index
    %0 = vector.load %arg4[%c0, %c0_0] : memref<8x128xf32, #tpu.memory_space<vmem>>, vector<8x128xf32>
    %c0_1 = arith.constant 0 : index
    %c0_2 = arith.constant 0 : index
    %1 = vector.load %arg5[%c0_1, %c0_2] : memref<1x128xf32, #tpu.memory_space<vmem>>, vector<1x128xf32>
    %2 = vector.shape_cast %1 : vector<1x128xf32> to vector<1x128xf32>
    %3 = vector.broadcast %2 : vector<1x128xf32> to vector<8x128xf32>
    %c0_3 = arith.constant 0 : index
    %4 = memref.load %arg1[%c0_3] : memref<8xf32, #tpu.memory_space<smem>>
    %5 = vector.broadcast %4 : f32 to vector<8x128xf32>
    %6 = arith.subf %0, %5 : vector<8x128xf32>
    %c0_4 = arith.constant 0 : index
    %7 = memref.load %arg3[%c0_4] : memref<8xf32, #tpu.memory_space<smem>>
    %8 = arith.mulf %6, %6 : vector<8x128xf32>
    %c0_5 = arith.constant 0 : index
    %9 = memref.load %arg2[%c0_5] : memref<8xf32, #tpu.memory_space<smem>>
    %10 = vector.broadcast %9 : f32 to vector<8x128xf32>
    %11 = arith.mulf %8, %10 : vector<8x128xf32>
    %12 = math.exp %11 : vector<8x128xf32>
    %13 = vector.broadcast %7 : f32 to vector<8x128xf32>
    %14 = arith.mulf %13, %12 : vector<8x128xf32>
    %15 = arith.addf %3, %14 : vector<8x128xf32>
    %c1 = arith.constant 1 : index
    %16 = memref.load %arg1[%c1] : memref<8xf32, #tpu.memory_space<smem>>
    %17 = vector.broadcast %16 : f32 to vector<8x128xf32>
    %18 = arith.subf %0, %17 : vector<8x128xf32>
    %c1_6 = arith.constant 1 : index
    %19 = memref.load %arg3[%c1_6] : memref<8xf32, #tpu.memory_space<smem>>
    %20 = arith.mulf %18, %18 : vector<8x128xf32>
    %c1_7 = arith.constant 1 : index
    %21 = memref.load %arg2[%c1_7] : memref<8xf32, #tpu.memory_space<smem>>
    %22 = vector.broadcast %21 : f32 to vector<8x128xf32>
    %23 = arith.mulf %20, %22 : vector<8x128xf32>
    %24 = math.exp %23 : vector<8x128xf32>
    %25 = vector.broadcast %19 : f32 to vector<8x128xf32>
    %26 = arith.mulf %25, %24 : vector<8x128xf32>
    %27 = arith.addf %15, %26 : vector<8x128xf32>
    %c2 = arith.constant 2 : index
    %28 = memref.load %arg1[%c2] : memref<8xf32, #tpu.memory_space<smem>>
    %29 = vector.broadcast %28 : f32 to vector<8x128xf32>
    %30 = arith.subf %0, %29 : vector<8x128xf32>
    %c2_8 = arith.constant 2 : index
    %31 = memref.load %arg3[%c2_8] : memref<8xf32, #tpu.memory_space<smem>>
    %32 = arith.mulf %30, %30 : vector<8x128xf32>
    %c2_9 = arith.constant 2 : index
    %33 = memref.load %arg2[%c2_9] : memref<8xf32, #tpu.memory_space<smem>>
    %34 = vector.broadcast %33 : f32 to vector<8x128xf32>
    %35 = arith.mulf %32, %34 : vector<8x128xf32>
    %36 = math.exp %35 : vector<8x128xf32>
    %37 = vector.broadcast %31 : f32 to vector<8x128xf32>
    %38 = arith.mulf %37, %36 : vector<8x128xf32>
    %39 = arith.addf %27, %38 : vector<8x128xf32>
    %c3 = arith.constant 3 : index
    %40 = memref.load %arg1[%c3] : memref<8xf32, #tpu.memory_space<smem>>
    %41 = vector.broadcast %40 : f32 to vector<8x128xf32>
    %42 = arith.subf %0, %41 : vector<8x128xf32>
    %c3_10 = arith.constant 3 : index
    %43 = memref.load %arg3[%c3_10] : memref<8xf32, #tpu.memory_space<smem>>
    %44 = arith.mulf %42, %42 : vector<8x128xf32>
    %c3_11 = arith.constant 3 : index
    %45 = memref.load %arg2[%c3_11] : memref<8xf32, #tpu.memory_space<smem>>
    %46 = vector.broadcast %45 : f32 to vector<8x128xf32>
    %47 = arith.mulf %44, %46 : vector<8x128xf32>
    %48 = math.exp %47 : vector<8x128xf32>
    %49 = vector.broadcast %43 : f32 to vector<8x128xf32>
    %50 = arith.mulf %49, %48 : vector<8x128xf32>
    %51 = arith.addf %39, %50 : vector<8x128xf32>
    %c4 = arith.constant 4 : index
    %52 = memref.load %arg1[%c4] : memref<8xf32, #tpu.memory_space<smem>>
    %53 = vector.broadcast %52 : f32 to vector<8x128xf32>
    %54 = arith.subf %0, %53 : vector<8x128xf32>
    %c4_12 = arith.constant 4 : index
    %55 = memref.load %arg3[%c4_12] : memref<8xf32, #tpu.memory_space<smem>>
    %56 = arith.mulf %54, %54 : vector<8x128xf32>
    %c4_13 = arith.constant 4 : index
    %57 = memref.load %arg2[%c4_13] : memref<8xf32, #tpu.memory_space<smem>>
    %58 = vector.broadcast %57 : f32 to vector<8x128xf32>
    %59 = arith.mulf %56, %58 : vector<8x128xf32>
    %60 = math.exp %59 : vector<8x128xf32>
    %61 = vector.broadcast %55 : f32 to vector<8x128xf32>
    %62 = arith.mulf %61, %60 : vector<8x128xf32>
    %63 = arith.addf %51, %62 : vector<8x128xf32>
    %c5 = arith.constant 5 : index
    %64 = memref.load %arg1[%c5] : memref<8xf32, #tpu.memory_space<smem>>
    %65 = vector.broadcast %64 : f32 to vector<8x128xf32>
    %66 = arith.subf %0, %65 : vector<8x128xf32>
    %c5_14 = arith.constant 5 : index
    %67 = memref.load %arg3[%c5_14] : memref<8xf32, #tpu.memory_space<smem>>
    %68 = arith.mulf %66, %66 : vector<8x128xf32>
    %c5_15 = arith.constant 5 : index
    %69 = memref.load %arg2[%c5_15] : memref<8xf32, #tpu.memory_space<smem>>
    %70 = vector.broadcast %69 : f32 to vector<8x128xf32>
    %71 = arith.mulf %68, %70 : vector<8x128xf32>
    %72 = math.exp %71 : vector<8x128xf32>
    %73 = vector.broadcast %67 : f32 to vector<8x128xf32>
    %74 = arith.mulf %73, %72 : vector<8x128xf32>
    %75 = arith.addf %63, %74 : vector<8x128xf32>
    %c6 = arith.constant 6 : index
    %76 = memref.load %arg1[%c6] : memref<8xf32, #tpu.memory_space<smem>>
    %77 = vector.broadcast %76 : f32 to vector<8x128xf32>
    %78 = arith.subf %0, %77 : vector<8x128xf32>
    %c6_16 = arith.constant 6 : index
    %79 = memref.load %arg3[%c6_16] : memref<8xf32, #tpu.memory_space<smem>>
    %80 = arith.mulf %78, %78 : vector<8x128xf32>
    %c6_17 = arith.constant 6 : index
    %81 = memref.load %arg2[%c6_17] : memref<8xf32, #tpu.memory_space<smem>>
    %82 = vector.broadcast %81 : f32 to vector<8x128xf32>
    %83 = arith.mulf %80, %82 : vector<8x128xf32>
    %84 = math.exp %83 : vector<8x128xf32>
    %85 = vector.broadcast %79 : f32 to vector<8x128xf32>
    %86 = arith.mulf %85, %84 : vector<8x128xf32>
    %87 = arith.addf %75, %86 : vector<8x128xf32>
    %c7 = arith.constant 7 : index
    %88 = memref.load %arg1[%c7] : memref<8xf32, #tpu.memory_space<smem>>
    %89 = vector.broadcast %88 : f32 to vector<8x128xf32>
    %90 = arith.subf %0, %89 : vector<8x128xf32>
    %c7_18 = arith.constant 7 : index
    %91 = memref.load %arg3[%c7_18] : memref<8xf32, #tpu.memory_space<smem>>
    %92 = arith.mulf %90, %90 : vector<8x128xf32>
    %c7_19 = arith.constant 7 : index
    %93 = memref.load %arg2[%c7_19] : memref<8xf32, #tpu.memory_space<smem>>
    %94 = vector.broadcast %93 : f32 to vector<8x128xf32>
    %95 = arith.mulf %92, %94 : vector<8x128xf32>
    %96 = math.exp %95 : vector<8x128xf32>
    %97 = vector.broadcast %91 : f32 to vector<8x128xf32>
    %98 = arith.mulf %97, %96 : vector<8x128xf32>
    %99 = arith.addf %87, %98 : vector<8x128xf32>
    %c0_20 = arith.constant 0 : index
    %c0_21 = arith.constant 0 : index
    %100 = vector.load %arg6[%c0_20, %c0_21] : memref<8x128xf32, #tpu.memory_space<vmem>>, vector<8x128xf32>
    tpu.vector_store %arg6[%c0_20, %c0_21], %99 {strides = array<i32>} : memref<8x128xf32, #tpu.memory_space<vmem>>, vector<8x128xf32>,
    return
  }
  func.func @transform_0(%arg0: i32) -> i32 {
    %c0_i32 = arith.constant 0 : i32
    %c0_i32_0 = arith.constant 0 : i32
    return %c0_i32 : i32
  }
  func.func @transform_1(%arg0: i32) -> i32 {
    %c0_i32 = arith.constant 0 : i32
    %c0_i32_0 = arith.constant 0 : i32
    return %c0_i32 : i32
  }
  func.func @transform_2(%arg0: i32) -> i32 {
    %c0_i32 = arith.constant 0 : i32
    %c0_i32_0 = arith.constant 0 : i32
    return %c0_i32 : i32
  }
  func.func @transform_3(%arg0: i32) -> (i32, i32) {
    %c0_i32 = arith.constant 0 : i32
    %c0_i32_0 = arith.constant 0 : i32
    return %arg0, %c0_i32 : i32, i32
  }
  func.func @transform_4(%arg0: i32) -> (i32, i32) {
    %c0_i32 = arith.constant 0 : i32
    %c0_i32_0 = arith.constant 0 : i32
    %c0_i32_1 = arith.constant 0 : i32
    return %c0_i32, %c0_i32_0 : i32, i32
  }
  func.func @transform_5(%arg0: i32) -> (i32, i32) {
    %c0_i32 = arith.constant 0 : i32
    %c0_i32_0 = arith.constant 0 : i32
    return %arg0, %c0_i32 : i32, i32
  }
}

</mosaic_0001>

<bundles_post_ra>
// kernel: tpu_custom_call.1
= control target key start
LH: loop header
LB: loop body
LE: loop exit
PB: predicated region body
PF: predicated region fallthrough
CT: control target
= control target key end

     0   :  { %10 = vsyncpa [#allocation4], 0  ;;  %s401_s0 = inlined_call_operand.hbm [shape: f32[8], index: 0, kind: input, shape index: {}]   ;;  %s402_s1 = inlined_call_operand.vmem [shape: f32[8], index: 1, kind: input, shape index: {}]   ;;  %s403_s2 = inlined_call_operand.vmem [shape: f32[8], index: 2, kind: input, shape index: {}]   ;;  %s404_s3 = inlined_call_operand.vmem [shape: f32[8,128], index: 3, kind: input, shape index: {}]   ;;  %s405_s4 = inlined_call_operand.vmem [shape: f32[1,128], index: 4, kind: input, shape index: {}]   ;;  %s406_s5 = inlined_call_operand.hbm [shape: f32[8,128], index: 5, kind: output, shape index: {}]  }
   0x1   :  { %11 = vsyncpa [#allocation5], 0 }
   0x2   :  { %12 = vsyncpa [#allocation8], 0 }
   0x3   :  { %13 = vsyncpa [#allocation3], 0  ;;  %s28_s20 = sshll.u32 %s402_s1, 4  ;;  %s228_s23 = scalar_lea.hbm %s401_s0, 16  ;;  %s29_s20 = int_to_ptr.vmem [resolvable:$true] %s28_s20 }
   0x4   :  { %p229_p0 = scmp.ne.s32.totalorder %s401_s0, %s228_s23  ;;  %p232_p1 = scmp.lt.u32.totalorder %s228_s23, %s401_s0 }
   0x6   :  { %p234_p2 = pnand %p232_p1, %p229_p0 }
   0x8   :  { %237 = shalt.err (!%p234_p2)
}
   0x9   :  { %s292_s28 = smov [#allocation2]   ;;  %s238_s1 = scalar_lea.vmem %s29_s20, 16 }
   0xa   :  { %21 = dma.hbm_to_smem %s401_s0, 16, %s292_s28, [#allocation4]  }
   0xb   :  { %p239_p3 = scmp.ne.s32.totalorder %s29_s20, %s238_s1  ;;  %p243_p4 = scmp.lt.s32.totalorder %s29_s20, %s29_s20 }
   0xc   :  { %p244_p5 = scmp.lt.s32.totalorder %s238_s1, %s238_s1 }
   0xe   :  { %p245_p6 = por %p244_p5, %p243_p4 }
  0x10   :  { %p246_p7 = pnand %p245_p6, %p239_p3 }
  0x12   :  { %249 = shalt.err (!%p246_p7)
}
  0x13   :  { %s293_s6 = smov [#allocation6]   ;;  %s38_s9 = sshll.u32 %s403_s2, 4  ;;  %s39_s9 = int_to_ptr.vmem [resolvable:$true] %s38_s9 }
  0x14   :  { %31 = dma.vmem_to_smem %s29_s20, 16, %s293_s6, [#allocation5]  }
  0x15   :  { %s250_s10 = scalar_lea.vmem %s39_s9, 16  ;;  %p255_p9 = scmp.lt.s32.totalorder %s39_s9, %s39_s9 }
  0x16   :  { %p251_p8 = scmp.ne.s32.totalorder %s39_s9, %s250_s10  ;;  %p256_p10 = scmp.lt.s32.totalorder %s250_s10, %s250_s10 }
  0x18   :  { %p257_p11 = por %p256_p10, %p255_p9 }
  0x1a   :  { %p258_p12 = pnand %p257_p11, %p251_p8 }
  0x1c   :  { %261 = shalt.err (!%p258_p12)
}
  0x1d   :  { %s294_s0 = smov [#allocation7]  }
  0x1e   :  { %41 = dma.vmem_to_smem %s39_s9, 16, %s294_s0, [#allocation8]  }
  0x1f   :  { %284 = dma.done.wait [#allocation4], 16  }
  0x20   :  { %285 = vsyncadd [#allocation4], 4294967280 }
  0x21   :  { %286 = dma.done.wait [#allocation5], 16  }
  0x22   :  { %287 = vsyncadd [#allocation5], 4294967280 }
  0x23   :  { %288 = dma.done.wait [#allocation8], 16  }
  0x24   :  { %289 = vsyncadd [#allocation8], 4294967280 }
  0x25   :  { %55 = sfence }
  0x26   :  { %s64_s11 = sld [smem:[#allocation2]]  ;;  %s187_s2 = sld [smem:[#allocation2 + $0x1]]  ;;  %v56_v0 = vld [vmem:[%s404_s3] sm:$0xff] }
  0x27   :  { %s69_s12 = sld [smem:[#allocation6]]  ;;  %s189_s13 = sld [smem:[#allocation6 + $0x1]]  ;;  %v186_v50 = vld [vmem:[%s405_s4] ss:$0 sm:$0xff] }
  0x28   :  { %s190_s14 = sld [smem:[#allocation2 + $0x2]]  ;;  %s193_s18 = sld [smem:[#allocation2 + $0x3]] }
  0x29   :  { %s347_s17 = sld [smem:[#allocation6 + $0x2]]  ;;  %s349_s19 = sld [smem:[#allocation6 + $0x3]] }
  0x2a   :  { %s196_s20 = sld [smem:[#allocation2 + $0x4]]  ;;  %s199_s22 = sld [smem:[#allocation2 + $0x5]] }
  0x2b   :  { %s351_s21 = sld [smem:[#allocation6 + $0x4]]  ;;  %s353_s23 = sld [smem:[#allocation6 + $0x5]] }
  0x2c   :  { %v65_v1 = vstv %s64_s11  ;;  %v78_v4 = vstv %s187_s2  ;;  %s355_s3 = sld [smem:[#allocation2 + $0x6]]  ;;  %s360_s25 = sld [smem:[#allocation2 + $0x7]] }
  0x2d   :  { %v66_v2 = vsub.f32 %v56_v0, %v65_v1  ;;  %v70_v3 = vstv %s69_s12  ;;  %v79_v6 = vsub.f32 %v56_v0, %v78_v4  ;;  %v83_v8 = vstv %s189_s13  ;;  %s358_s24 = sld [smem:[#allocation6 + $0x6]]  ;;  %s363_s26 = sld [smem:[#allocation6 + $0x7]] }
  0x2e   :  { %v91_v7 = vstv %s190_s14  ;;  %v104_v13 = vstv %s193_s18  ;;  %s366_s27 = sld [smem:[#allocation7]]  ;;  %s369_s28 = sld [smem:[#allocation7 + $0x1]] }
  0x2f   :  { %v68_v5 = vmul.f32 %v66_v2, %v66_v2  ;;  %v92_v9 = vsub.f32 %v56_v0, %v91_v7  ;;  %v81_v11 = vmul.f32 %v79_v6, %v79_v6  ;;  %v96_v12 = vstv %s347_s17  ;;  %s372_s29 = sld [smem:[#allocation7 + $0x2]]  ;;  %s376_s30 = sld [smem:[#allocation7 + $0x3]] }
  0x30   :  { %v105_v15 = vsub.f32 %v56_v0, %v104_v13  ;;  %v117_v16 = vstv %s196_s20  ;;  %v109_v19 = vstv %s349_s19  ;;  %v130_v24 = vstv %s199_s22  ;;  %s378_s1 = sld [smem:[#allocation7 + $0x4]]  ;;  %s200_s6 = sld [smem:[#allocation7 + $0x5]] }
  0x31   :  { %v71_v10 = vmul.f32 %v70_v3, %v68_v5  ;;  %v94_v14 = vmul.f32 %v92_v9, %v92_v9  ;;  %v84_v18 = vmul.f32 %v83_v8, %v81_v11  ;;  %v118_v20 = vsub.f32 %v56_v0, %v117_v16  ;;  %s203_s9 = sld [smem:[#allocation7 + $0x6]]  ;;  %s206_s10 = sld [smem:[#allocation7 + $0x7]] }
  0x32   :  { %v107_v22 = vmul.f32 %v105_v15, %v105_v15  ;;  %v122_v23 = vstv %s351_s21  ;;  %v131_v27 = vsub.f32 %v56_v0, %v130_v24  ;;  %v135_v30 = vstv %s353_s23  ;;  %s295_s4 = smov [#allocation9]  }
  0x33   :  { %v72_v17 = vmul.f32 1.442695, %v71_v10  ;;  %v97_v21 = vmul.f32 %v96_v12, %v94_v14  ;;  %v85_v25 = vmul.f32 1.442695, %v84_v18  ;;  %v120_v26 = vmul.f32 %v118_v20, %v118_v20  ;;  %s175_s0 = sshll.u32 %s295_s4, 4  ;;  %s176_s0 = int_to_ptr.vmem [resolvable:$true] %s175_s0 }
  0x34   :  { %v110_v29 = vmul.f32 %v109_v19, %v107_v22  ;;  %v133_v32 = vmul.f32 %v131_v27, %v131_v27  ;;  %v143_v33 = vstv %s355_s3  ;;  %v148_v38 = vstv %s358_s24  ;;  %s262_s11 = scalar_lea.vmem %s176_s0, 128  ;;  %p267_p0 = scmp.lt.s32.totalorder %s176_s0, %s176_s0 }
  0x35   :  { %212 = vpow2.f32 %v72_v17  ;;  %v98_v28 = vmul.f32 1.442695, %v97_v21  ;;  %v123_v31 = vmul.f32 %v122_v23, %v120_v26  ;;  %v144_v35 = vsub.f32 %v56_v0, %v143_v33  ;;  %p263_p13 = scmp.ne.s32.totalorder %s176_s0, %s262_s11  ;;  %p268_p1 = scmp.lt.s32.totalorder %s262_s11, %s262_s11 }
  0x36   :  { %214 = vpow2.f32 %v85_v25  ;;  %v111_v34 = vmul.f32 1.442695, %v110_v29  ;;  %v136_v37 = vmul.f32 %v135_v30, %v133_v32  ;;  %v156_v39 = vstv %s360_s25 }
  0x37   :  { %216 = vpow2.f32 %v98_v28  ;;  %v124_v36 = vmul.f32 1.442695, %v123_v31  ;;  %v146_v40 = vmul.f32 %v144_v35, %v144_v35  ;;  %v157_v41 = vsub.f32 %v56_v0, %v156_v39  ;;  %p269_p2 = por %p268_p1, %p267_p0 }
  0x38   :  { %218 = vpow2.f32 %v111_v34  ;;  %v137_v42 = vmul.f32 1.442695, %v136_v37  ;;  %v161_v43 = vstv %s363_s26  ;;  %v74_v46 = vstv %s366_s27 }
  0x39   :  { %220 = vpow2.f32 %v124_v36  ;;  %v149_v44 = vmul.f32 %v148_v38, %v146_v40  ;;  %v159_v45 = vmul.f32 %v157_v41, %v157_v41  ;;  %v87_v51 = vstv %s369_s28  ;;  %p270_p3 = pnand %p269_p2, %p263_p13 }
  0x3a   :  { %222 = vpow2.f32 %v137_v42  ;;  %v100_v53 = vstv %s372_s29  ;;  %v113_v59 = vstv %s376_s30  ;;  %v126_v61 = vstv %s378_s1 }
  0x3b   :  { %v150_v47 = vmul.f32 1.442695, %v149_v44  ;;  %v162_v48 = vmul.f32 %v161_v43, %v159_v45  ;;  %v139_v2 = vstv %s200_s6  ;;  %v152_v8 = vstv %s203_s9 }
  0x3c   :  { %v165_v11 = vstv %s206_s10 }
  0x3d   :  { %224 = vpow2.f32 %v150_v47  ;;  %v163_v54 = vmul.f32 1.442695, %v162_v48 }
  0x3f   :  { %v213_v49 = vpop.eup %212  ;;  %226 = vpow2.f32 %v163_v54 }
  0x40   :  { %v75_v52 = vmul.f32 %v213_v49, %v74_v46  ;;  %v215_v55 = vpop.eup %214 }
  0x41   :  { %v217_v56 = vpop.eup %216  ;;  %v88_v58 = vmul.f32 %v215_v55, %v87_v51 }
  0x42   :  { %v76_v57 = vadd.f32 %v186_v50, %v75_v52  ;;  %v101_v60 = vmul.f32 %v217_v56, %v100_v53  ;;  %v219_v62 = vpop.eup %218 }
  0x43   :  { %v221_v0 = vpop.eup %220  ;;  %v114_v1 = vmul.f32 %v219_v62, %v113_v59 }
  0x44   :  { %v89_v63 = vadd.f32 %v88_v58, %v76_v57  ;;  %v127_v4 = vmul.f32 %v221_v0, %v126_v61  ;;  %v223_v5 = vpop.eup %222 }
  0x45   :  { %v140_v7 = vmul.f32 %v223_v5, %v139_v2 }
  0x46   :  { %v102_v3 = vadd.f32 %v101_v60, %v89_v63 }
  0x47   :  { %v225_v9 = vpop.eup %224 }
  0x48   :  { %v115_v6 = vadd.f32 %v114_v1, %v102_v3  ;;  %v153_v12 = vmul.f32 %v225_v9, %v152_v8 }
  0x49   :  { %v227_v13 = vpop.eup %226 }
  0x4a   :  { %v128_v10 = vadd.f32 %v127_v4, %v115_v6  ;;  %v166_v15 = vmul.f32 %v227_v13, %v165_v11 }
  0x4c   :  { %v141_v14 = vadd.f32 %v140_v7, %v128_v10 }
  0x4e   :  { %v154_v16 = vadd.f32 %v153_v12, %v141_v14 }
  0x50   :  { %v167_v17 = vadd.f32 %v166_v15, %v154_v16 }
  0x52   :  { %168 = vst [vmem:[#allocation9] sm:$0xff] %v167_v17 }
  0x53   :  { %273 = shalt.err (!%p270_p3)
}
  0x54   :  { %s274_s13 = scalar_lea.hbm %s406_s5, 128 }
  0x55   :  { %p275_p4 = scmp.ne.s32.totalorder %s406_s5, %s274_s13  ;;  %p278_p5 = scmp.lt.u32.totalorder %s274_s13, %s406_s5 }
  0x57   :  { %p280_p6 = pnand %p278_p5, %p275_p4 }
  0x59   :  { %283 = shalt.err (!%p280_p6)
}
  0x5a   :  { %178 = dma.vmem_to_hbm [thread:$0]  %s176_s0, 128, %s406_s5, [#allocation3]  }
  0x5b   :  { %290 = dma.done.wait [#allocation3], 128  }
  0x5c   :  { %291 = vsyncadd [#allocation3], 4294967168 }
  0x5d   :  { %182 = vsyncpa [#allocation3], 1 }
  0x5e   :  { %183 = vsyncpa [#allocation4], 1 }
  0x5f   :  { %184 = vsyncpa [#allocation5], 1 }
  0x60   :  { %185 = vsyncpa [#allocation8], 1 }

</bundles_post_ra>
